<compile_context>
chip_gen: v5e
topology: v5e:2x2
jax: 0.10.0
libtpu: 0.0.40
codegen_flags: <defaults>
</compile_context>

<pallas_src>
import functools
import math

import jax
import jax.numpy as jnp
from jax import lax
from jax.experimental import pallas as pl
from jax.experimental.pallas import tpu as pltpu


def _round_up(n, m):
    return ((n + m - 1) // m) * m


def imgnet_kernel(x_ref, w_ref, b_ref, out_ref, *, alpha, code_len):
    # x_ref:   (TM, 512)         compute dtype (bf16 by default)
    # w_ref:   (code_len, 512)   torch Linear layout, compute dtype
    # b_ref:   (1, code_len)     f32
    # out_ref: (TM, 2*code_len)  f32 — lanes [0:code_len]=hid, [code_len:]=code
    hid = lax.dot_general(
        x_ref[...], w_ref[...],
        dimension_numbers=(((1,), (1,)), ((), ())),   # x @ w.T on the MXU
        preferred_element_type=jnp.float32,
    ) + b_ref[...]
    if alpha == 1.0:
        code = jnp.tanh(hid)                          # tanh -> EUP slot
    else:
        code = jnp.tanh(jnp.float32(alpha) * hid)
    # Pack both results into one lane-dense output slab (single DMA per tile).
    out_ref[:, :code_len] = hid
    out_ref[:, code_len:] = code


def imgnet_forward(x, w, b, alpha=1.0, *, tm=1024, compute_dtype=jnp.bfloat16):
    """x: [B, 512] f32, w: [code_len, 512] (torch Linear layout), b: [code_len].

    Returns (hid, code) in f32, matching ImgNet.forward.
    alpha is treated as a compile-time constant (set_alpha -> retrace per epoch).
    """
    B, D = x.shape
    code_len, Dw = w.shape
    assert D == Dw, "feature dim mismatch"

    # Tile the batch; TM multiple of 16 (bf16 sublane packing), pad B up to it.
    TM = min(_round_up(tm, 16), _round_up(B, 16))
    Bp = _round_up(B, TM)

    xc = x.astype(compute_dtype)
    if Bp != B:
        xc = jnp.pad(xc, ((0, Bp - B), (0, 0)))
    wc = w.astype(compute_dtype)
    b2 = b.reshape(1, code_len).astype(jnp.float32)

    kernel = functools.partial(imgnet_kernel, alpha=float(alpha), code_len=code_len)

    fused = pl.pallas_call(
        kernel,
        out_shape=jax.ShapeDtypeStruct((Bp, 2 * code_len), jnp.float32),
        grid_spec=pltpu.PrefetchScalarGridSpec(
            num_scalar_prefetch=0,
            grid=(Bp // TM,),
            in_specs=[
                pl.BlockSpec((TM, D), lambda i: (i, 0)),          # x tile (pipelined)
                pl.BlockSpec((code_len, D), lambda i: (0, 0)),    # weight (resident)
                pl.BlockSpec((1, code_len), lambda i: (0, 0)),    # bias   (resident)
            ],
            out_specs=pl.BlockSpec((TM, 2 * code_len), lambda i: (i, 0)),
        ),
        compiler_params=pltpu.CompilerParams(
            dimension_semantics=("parallel",),   # megacore-shardable batch axis
        ),
    )(xc, wc, b2)

    hid = fused[:B, :code_len]
    code = fused[:B, code_len:]
    return hid, code


def init_params(key, code_len, in_features=512):
    # Deterministic init mirroring torch.nn.Linear defaults (kaiming-uniform bound).
    kw, kb = jax.random.split(key)
    bound = 1.0 / math.sqrt(in_features)
    w = jax.random.uniform(kw, (code_len, in_features), jnp.float32, -bound, bound)
    b = jax.random.uniform(kb, (code_len,), jnp.float32, -bound, bound)
    return w, b


if __name__ == "__main__":
    key = jax.random.PRNGKey(0)
    kx, kp = jax.random.split(key)

    B = 8
    code_len = 64
    x = jax.random.normal(kx, (B, 512), dtype=jnp.float32)
    w, b = init_params(kp, code_len)
    alpha = 1.0  # ImgNet.__init__ sets alpha = 1.0

    hid, code = imgnet_forward(x, w, b, alpha)
    jax.block_until_ready((hid, code))

    # Reference matching the kernel's numerics (bf16 inputs, f32 accumulate).
    xb = x.astype(jnp.bfloat16).astype(jnp.float32)
    wb = w.astype(jnp.bfloat16).astype(jnp.float32)
    hid_ref = xb @ wb.T + b
    code_ref = jnp.tanh(alpha * hid_ref)
    assert jnp.allclose(hid, hid_ref, atol=2e-3, rtol=2e-3), "hid mismatch"
    assert jnp.allclose(code, code_ref, atol=2e-3, rtol=2e-3), "code mismatch"

    # Loose sanity check against the full-f32 reference (bf16 input quantization).
    hid_f32 = x @ w.T + b
    assert jnp.allclose(hid, hid_f32, atol=5e-2, rtol=5e-2), "hid far from f32 ref"

    print("KERNEL_OK")
</pallas_src>

<mosaic_0001>
module attributes {stable_mosaic.version = 11 : i64} {
  func.func @imgnet_kernel(%arg0: i32, %arg1: memref<16x512xbf16, #tpu.memory_space<vmem>>, %arg2: memref<64x512xbf16, #tpu.memory_space<vmem>>, %arg3: memref<1x64xf32, #tpu.memory_space<vmem>>, %arg4: memref<16x128xf32, #tpu.memory_space<vmem>>) attributes {dimension_semantics = [#tpu.dimension_semantics<parallel>], iteration_bounds = array<i64: 1>, scalar_prefetch = 0 : i64, scratch_operands = 0 : i64, tpu.core_type = #tpu.core_type<tc>, window_params = [{transform_indices = @transform_0, window_bounds = array<i64: 16, 512>}, {pipeline_mode = #tpu.pipeline_mode<synchronous>, transform_indices = @transform_1, window_bounds = array<i64: 64, 512>}, {pipeline_mode = #tpu.pipeline_mode<synchronous>, transform_indices = @transform_2, window_bounds = array<i64: 1, 64>}, {transform_indices = @transform_3, window_bounds = array<i64: 16, 128>}]} {
    %c0 = arith.constant 0 : index
    %c0_0 = arith.constant 0 : index
    %0 = vector.load %arg1[%c0, %c0_0] : memref<16x512xbf16, #tpu.memory_space<vmem>>, vector<16x512xbf16>
    %c0_1 = arith.constant 0 : index
    %c0_2 = arith.constant 0 : index
    %1 = vector.load %arg2[%c0_1, %c0_2] : memref<64x512xbf16, #tpu.memory_space<vmem>>, vector<64x512xbf16>
    %cst = arith.constant dense<0.000000e+00> : vector<16x64xf32>
    %2 = tpu.matmul %0, %1, %cst {dimension_numbers = #tpu.dot_dimension_numbers<[1], [1], [0], [0], [0, 0, 1, 0], [], []>} : vector<16x512xbf16>, vector<64x512xbf16>, vector<16x64xf32> -> vector<16x64xf32>
    %c0_3 = arith.constant 0 : index
    %c0_4 = arith.constant 0 : index
    %3 = vector.load %arg3[%c0_3, %c0_4] : memref<1x64xf32, #tpu.memory_space<vmem>>, vector<1x64xf32>
    %4 = vector.broadcast %3 : vector<1x64xf32> to vector<16x64xf32>
    %5 = arith.addf %2, %4 : vector<16x64xf32>
    %6 = math.tanh %5 : vector<16x64xf32>
    %c0_5 = arith.constant 0 : index
    %c0_6 = arith.constant 0 : index
    %7 = vector.load %arg4[%c0_5, %c0_6] : memref<16x128xf32, #tpu.memory_space<vmem>>, vector<16x64xf32>
    tpu.vector_store %arg4[%c0_5, %c0_6], %5 {strides = array<i32>} : memref<16x128xf32, #tpu.memory_space<vmem>>, vector<16x64xf32>,
    %c0_7 = arith.constant 0 : index
    %c64 = arith.constant 64 : index
    %8 = vector.load %arg4[%c0_7, %c64] : memref<16x128xf32, #tpu.memory_space<vmem>>, vector<16x64xf32>
    tpu.vector_store %arg4[%c0_7, %c64], %6 {strides = array<i32>} : memref<16x128xf32, #tpu.memory_space<vmem>>, vector<16x64xf32>,
    return
  }
  func.func @transform_0(%arg0: i32) -> (i32, i32) {
    %c0_i32 = arith.constant 0 : i32
    %c0_i32_0 = arith.constant 0 : i32
    return %arg0, %c0_i32 : i32, i32
  }
  func.func @transform_1(%arg0: i32) -> (i32, i32) {
    %c0_i32 = arith.constant 0 : i32
    %c0_i32_0 = arith.constant 0 : i32
    %c0_i32_1 = arith.constant 0 : i32
    return %c0_i32, %c0_i32_0 : i32, i32
  }
  func.func @transform_2(%arg0: i32) -> (i32, i32) {
    %c0_i32 = arith.constant 0 : i32
    %c0_i32_0 = arith.constant 0 : i32
    %c0_i32_1 = arith.constant 0 : i32
    return %c0_i32, %c0_i32_0 : i32, i32
  }
  func.func @transform_3(%arg0: i32) -> (i32, i32) {
    %c0_i32 = arith.constant 0 : i32
    %c0_i32_0 = arith.constant 0 : i32
    return %arg0, %c0_i32 : i32, i32
  }
}

</mosaic_0001>

<bundles_post_ra>
// kernel: tpu_custom_call.1
= control target key start
LH: loop header
LB: loop body
LE: loop exit
PB: predicated region body
PF: predicated region fallthrough
CT: control target
= control target key end

     0   :  { %8 = vsyncpa [#allocation3], 0  ;;  %s495_s0 = inlined_call_operand.hbm [shape: bf16[16,512], index: 0, kind: input, shape index: {}]   ;;  %s496_s1 = inlined_call_operand.hbm [shape: bf16[64,512], index: 1, kind: input, shape index: {}]   ;;  %s497_s2 = inlined_call_operand.vmem [shape: f32[1,64], index: 2, kind: input, shape index: {}]   ;;  %s498_s3 = inlined_call_operand.hbm [shape: f32[16,128], index: 3, kind: output, shape index: {}]  }
   0x1   :  { %9 = vsyncpa [#allocation6], 0 }
   0x2   :  { %10 = vsyncpa [#allocation4], 0  ;;  %s15_s14 = sshll.u32 %s495_s0, 4  ;;  %s455_s15 = smov [#allocation2]   ;;  %s16_s14 = int_to_ptr.hbm [resolvable:$true] %s15_s14 }
   0x3   :  { %s17_s16 = sshll.u32 %s455_s15, 4  ;;  %s28_s19 = sshll.u32 %s496_s1, 4  ;;  %s18_s16 = int_to_ptr.vmem [resolvable:$true] %s17_s16  ;;  %s29_s19 = int_to_ptr.hbm [resolvable:$true] %s28_s19 }
   0x4   :  { %s456_s20 = smov 256   ;;  %s457_s21 = smov 16  }
   0x5   :  { %23 = dma.hbm_to_vmem [thread:$0]  %s16_s14, 512, %s18_s16, [#allocation3], %s456_s20, %s456_s20, %s457_s21  }
   0x6   :  { %s458_s22 = smov [#allocation5]  }
   0x7   :  { %s30_s23 = sshll.u32 %s458_s22, 4  ;;  %s31_s23 = int_to_ptr.vmem [resolvable:$true] %s30_s23 }
   0x8   :  { %36 = dma.hbm_to_vmem [thread:$0]  %s29_s19, 2048, %s31_s23, [#allocation6], %s456_s20, %s456_s20, %s457_s21  }
   0x9   :  { %449 = dma.done.wait [#allocation3], 512  }
   0xa   :  { %450 = vsyncadd [#allocation3], 4294966784 }
   0xb   :  { %451 = dma.done.wait [#allocation6], 2048  }
   0xc   :  { %452 = vsyncadd [#allocation6], 4294965248  ;;  %v330_v0 = vld [vmem:[#allocation5 + $0x60] sm:$0xf]  ;;  %v362_v1 = vld [vmem:[#allocation5 + $0x6c] sm:$0xf0] }
   0xd   :  { %v360_v2 = vld [vmem:[#allocation5 + $0x64] sm:$0xf]  ;;  %v331_v3 = vor.u32 %v362_v1, %v330_v0  ;;  %v332_v4 = vld [vmem:[#allocation5 + $0x70] sm:$0xf0]  ;;  %v338_v5 = vld [vmem:[#allocation5 + $0x68] sm:$0xf] }
   0xe   :  { %v363_v6 = vld [vmem:[#allocation5 + $0x74] sm:$0xf0]  ;;  %v335_v7 = vor.u32 %v360_v2, %v332_v4  ;;  %v361_v9 = vld [vmem:[#allocation5 + $0x6c] sm:$0xf]  ;;  %v340_v10 = vld [vmem:[#allocation5 + $0x78] sm:$0xf0] }
   0xf   :  { %v339_v8 = vor.u32 %v363_v6, %v338_v5  ;;  %176 = vmatpush.bf16.xpose.msra.mxu0 %v331_v3  ;;  %v343_v11 = vor.u32 %v361_v9, %v340_v10  ;;  %v314_v12 = vld [vmem:[#allocation5 + $0x40] sm:$0xf]  ;;  %v358_v13 = vld [vmem:[#allocation5 + $0x4c] sm:$0xf0]  ;;  %v356_v14 = vld [vmem:[#allocation5 + $0x44] sm:$0xf] }
  0x10   :  { %190 = vmatpush.bf16.xpose.msra.mxu1 %v335_v7  ;;  %v316_v15 = vld [vmem:[#allocation5 + $0x50] sm:$0xf0]  ;;  %v322_v16 = vld [vmem:[#allocation5 + $0x48] sm:$0xf]  ;;  %v359_v17 = vld [vmem:[#allocation5 + $0x54] sm:$0xf0]  ;;  %v315_v20 = vor.u32 %v358_v13, %v314_v12 }
  0x11   :  { %204 = vmatpush.bf16.xpose.msra.mxu2 %v339_v8  ;;  %218 = vmatpush.bf16.xpose.msra.mxu3 %v343_v11  ;;  %v357_v18 = vld [vmem:[#allocation5 + $0x4c] sm:$0xf]  ;;  %v324_v19 = vld [vmem:[#allocation5 + $0x58] sm:$0xf0]  ;;  %v319_v21 = vor.u32 %v356_v14, %v316_v15  ;;  %v323_v22 = vor.u32 %v359_v17, %v322_v16  ;;  %v298_v24 = vld [vmem:[#allocation5 + $0x20] sm:$0xf] }
  0x12   :  { %v327_v23 = vor.u32 %v357_v18, %v324_v19  ;;  %v354_v25 = vld [vmem:[#allocation5 + $0x2c] sm:$0xf0]  ;;  %v352_v26 = vld [vmem:[#allocation5 + $0x24] sm:$0xf]  ;;  %v300_v27 = vld [vmem:[#allocation5 + $0x30] sm:$0xf0] }
  0x13   :  { %v306_v28 = vld [vmem:[#allocation5 + $0x28] sm:$0xf]  ;;  %v355_v29 = vld [vmem:[#allocation5 + $0x34] sm:$0xf0]  ;;  %v353_v30 = vld [vmem:[#allocation5 + $0x2c] sm:$0xf]  ;;  %v299_v32 = vor.u32 %v354_v25, %v298_v24  ;;  %v303_v33 = vor.u32 %v352_v26, %v300_v27 }
  0x14   :  { %v308_v31 = vld [vmem:[#allocation5 + $0x38] sm:$0xf0]  ;;  %v307_v34 = vor.u32 %v355_v29, %v306_v28  ;;  %v282_v36 = vld [vmem:[#allocation5] sm:$0xf]  ;;  %v350_v37 = vld [vmem:[#allocation5 + $0xc] sm:$0xf0] }
  0x15   :  { %v311_v35 = vor.u32 %v353_v30, %v308_v31  ;;  %v348_v38 = vld [vmem:[#allocation5 + $0x4] sm:$0xf]  ;;  %v284_v39 = vld [vmem:[#allocation5 + $0x10] sm:$0xf0]  ;;  %v290_v40 = vld [vmem:[#allocation5 + $0x8] sm:$0xf]  ;;  %v283_v44 = vor.u32 %v350_v37, %v282_v36 }
  0x16   :  { %v351_v41 = vld [vmem:[#allocation5 + $0x14] sm:$0xf0]  ;;  %v349_v42 = vld [vmem:[#allocation5 + $0xc] sm:$0xf]  ;;  %v292_v43 = vld [vmem:[#allocation5 + $0x18] sm:$0xf0]  ;;  %v287_v45 = vor.u32 %v348_v38, %v284_v39 }
  0x17   :  { %177 = vmatpush.bf16.xpose.msra.mxu0 %v315_v20  ;;  %v291_v46 = vor.u32 %v351_v41, %v290_v40  ;;  %v295_v47 = vor.u32 %v349_v42, %v292_v43  ;;  %v266_v48 = vld [vmem:[#allocation2] sm:$0xf]  ;;  %v346_v49 = vld [vmem:[#allocation2 + $0xc] sm:$0xf0]  ;;  %v344_v50 = vld [vmem:[#allocation2 + $0x4] sm:$0xf] }
  0x18   :  { %191 = vmatpush.bf16.xpose.msra.mxu1 %v319_v21  ;;  %v268_v51 = vld [vmem:[#allocation2 + $0x10] sm:$0xf0]  ;;  %v274_v52 = vld [vmem:[#allocation2 + $0x8] sm:$0xf]  ;;  %v347_v53 = vld [vmem:[#allocation2 + $0x14] sm:$0xf0]  ;;  %v267_v56 = vor.u32 %v346_v49, %v266_v48 }
  0x19   :  { %205 = vmatpush.bf16.xpose.msra.mxu2 %v323_v22  ;;  %219 = vmatpush.bf16.xpose.msra.mxu3 %v327_v23  ;;  %v345_v54 = vld [vmem:[#allocation2 + $0xc] sm:$0xf]  ;;  %v276_v55 = vld [vmem:[#allocation2 + $0x18] sm:$0xf0]  ;;  %v271_v57 = vor.u32 %v344_v50, %v268_v51  ;;  %v275_v58 = vor.u32 %v347_v53, %v274_v52  ;;  %v372_v60 = vld [vmem:[%s497_s2] ss:$0 sm:$0xff] }
  0x1a   :  { %v279_v59 = vor.u32 %v345_v54, %v276_v55  ;;  %vm230_vm0 = vcmask 523264   ;;  %s459_s2 = smov 64   ;;  %vm241_vm1 = vcmask 1048064   ;;  %s460_s24 = smov [#allocation7]  }
  0x1b   :  { %s248_s25 = sshll.u32 %s460_s24, 4  ;;  %s250_s28 = sshll.u32 %s498_s3, 4  ;;  %s249_s25 = int_to_ptr.vmem [resolvable:$true] %s248_s25  ;;  %s251_s28 = int_to_ptr.hbm [resolvable:$true] %s250_s28 }
  0x1c   :  { %s461_s29 = smov 128   ;;  %s462_s30 = smov 8  }
  0x1f   :  { %178 = vmatpush.bf16.xpose.msra.mxu0 %v299_v32 }
  0x20   :  { %192 = vmatpush.bf16.xpose.msra.mxu1 %v303_v33 }
  0x21   :  { %206 = vmatpush.bf16.xpose.msra.mxu2 %v307_v34  ;;  %220 = vmatpush.bf16.xpose.msra.mxu3 %v311_v35 }
  0x27   :  { %179 = vmatpush.bf16.xpose.msra.mxu0 %v283_v44 }
  0x28   :  { %193 = vmatpush.bf16.xpose.msra.mxu1 %v287_v45 }
  0x29   :  { %207 = vmatpush.bf16.xpose.msra.mxu2 %v291_v46  ;;  %221 = vmatpush.bf16.xpose.msra.mxu3 %v295_v47 }
  0x2e   :  { %180 = vmatmul.bf16.vlgmr.msra.gmra.mxu0 %v267_v56 }
  0x2f   :  { %194 = vmatmul.bf16.vlgmr.msra.gmra.mxu1 %v271_v57 }
  0x30   :  { %208 = vmatmul.bf16.vlgmr.msra.gmra.mxu2 %v275_v58  ;;  %222 = vmatmul.bf16.vlgmr.msra.gmra.mxu3 %v279_v59 }
  0xab   :  { %v181_v61 = vpop.f32.mrf.mxu0 }
  0xac   :  { %v182_v62 = vadd.f32 %v372_v60, %v181_v61  ;;  %v195_v63 = vpop.f32.mrf.mxu1 }
  0xae   :  { %v196_v0 = vadd.f32 %v195_v63, %v182_v62 }
  0xb3   :  { %v209_v1 = vpop.f32.mrf.mxu2  ;;  %v223_v3 = vpop.f32.mrf.mxu3 }
  0xb4   :  { %v210_v2 = vadd.f32 %v209_v1, %v196_v0  ;;  %v183_v4 = vpop.f32.mrf.mxu0  ;;  %v197_v7 = vpop.f32.mrf.mxu1 }
  0xb5   :  { %v184_v6 = vadd.f32 %v372_v60, %v183_v4 }
  0xb6   :  { %v224_v5 = vadd.f32 %v223_v3, %v210_v2 }
  0xb7   :  { %v198_v8 = vadd.f32 %v197_v7, %v184_v6 }
  0xb8   :  { %373 = vtanh.f32 %v224_v5  ;;  %231 = vst.msk [vmem:[#allocation7] sm:$0xff] %vm230_vm0, %v224_v5 }
  0xbb   :  { %v211_v9 = vpop.f32.mrf.mxu2  ;;  %v225_v11 = vpop.f32.mrf.mxu3 }
  0xbc   :  { %v212_v10 = vadd.f32 %v211_v9, %v198_v8 }
  0xbe   :  { %v374_v12 = vpop.eup %373  ;;  %v226_v13 = vadd.f32 %v225_v11, %v212_v10 }
  0xbf   :  { %235 = vrot.lane.b32.xlu0 %v374_v12, %s459_s2 }
  0xc0   :  { %375 = vtanh.f32 %v226_v13  ;;  %232 = vst.msk [vmem:[#allocation7 + $0x8] sm:$0xff] %vm230_vm0, %v226_v13 }
  0xc6   :  { %v376_v14 = vpop.eup %375 }
  0xc7   :  { %237 = vrot.lane.b32.xlu0 %v376_v14, %s459_s2 }
 0x131   :  { %v236_v15 = vpop.permute.xlu0 %235 }
 0x132   :  { %242 = vst.msk [vmem:[#allocation7] sm:$0xff] %vm241_vm1, %v236_v15 }
 0x139   :  { %v238_v16 = vpop.permute.xlu0 %237 }
 0x13a   :  { %243 = vst.msk [vmem:[#allocation7 + $0x8] sm:$0xff] %vm241_vm1, %v238_v16 }
 0x13b   :  { %256 = dma.vmem_to_hbm [thread:$0]  %s249_s25, 256, %s251_s28, [#allocation4], %s461_s29, %s461_s29, %s462_s30  }
 0x13c   :  { %453 = dma.done.wait [#allocation4], 256  }
 0x13d   :  { %454 = vsyncadd [#allocation4], 4294967040 }
 0x13e   :  { %261 = vsyncpa [#allocation3], 1 }
 0x13f   :  { %262 = vsyncpa [#allocation6], 1 }
 0x140   :  { %263 = vsyncpa [#allocation4], 1 }

</bundles_post_ra>
